<compile_context>
chip_gen: v7x
topology: tpu7x:2x2x1
jax: 0.10.0
libtpu: 0.0.40
codegen_flags: <defaults>
</compile_context>

<pallas_src>
import functools
import math

import jax
import jax.numpy as jnp
from jax import lax
from jax.experimental import pallas as pl
from jax.experimental.pallas import tpu as pltpu

_HIDDEN = 128


def _round_up(a, b):
    return (a + b - 1) // b * b


def _mix32(x):
    """Cheap 32-bit integer mix (xxhash-style finalizer) -> uniform u32 bits."""
    x = x ^ (x >> 16)
    x = x * jnp.uint32(0x7FEB352D)
    x = x ^ (x >> 15)
    x = x * jnp.uint32(0x846CA68B)
    x = x ^ (x >> 16)
    return x


def _mlp_logits_kernel(seed_ref, x_ref, w1_ref, b1_ref, w2_ref, b2_ref,
                       out_ref, *, training):
    """One row-tile of: Linear(D,128) -> ReLU -> Dropout(0.5) -> Linear(128,1).

    Lane-dense layout (batch rows on the lane axis):
      x_ref  : (TILE, D)
      w1_ref : (128, D)     b1_ref : (128, 1)
      w2_ref : (128, 1)     b2_ref : (1, 1)
      out_ref: (1, TILE)    -- raw (pre-softmax) weights for this tile
    """
    tile = x_ref.shape[0]

    # h[j, t] = sum_d w1[j, d] * x[t, d]   -> (128, TILE), f32 accumulate (MXU)
    h = lax.dot_general(
        w1_ref[...], x_ref[...],
        dimension_numbers=(((1,), (1,)), ((), ())),
        preferred_element_type=jnp.float32,
    )
    h = jnp.maximum(h + b1_ref[...], 0.0)                       # bias + ReLU

    if training:
        # Inverted dropout, p = 0.5.  Stateless hash keyed on
        # (seed, hidden unit j, global batch row): distinct bits per grid
        # tile, integer-only threshold test.
        j = lax.broadcasted_iota(jnp.int32, h.shape, 0).astype(jnp.uint32)
        row = (pl.program_id(0) * tile
               + lax.broadcasted_iota(jnp.int32, h.shape, 1)).astype(jnp.uint32)
        seed = seed_ref[0].astype(jnp.uint32)
        bits = _mix32(seed
                      + row * jnp.uint32(0x9E3779B9)
                      + j * jnp.uint32(0x85EBCA6B))
        keep = bits >= jnp.uint32(1 << 31)                      # P(keep) = 0.5
        h = jnp.where(keep, h * 2.0, 0.0)                       # scale 1/(1-p)

    # Second Linear(128, 1): output width 1 would waste the MXU, so use a
    # broadcast-multiply + sublane reduction instead -> lane-dense (1, TILE).
    raw = jnp.sum(h * w2_ref[...], axis=0, keepdims=True) + b2_ref[...]
    out_ref[...] = raw.astype(out_ref.dtype)


def _gumbel_softmax_kernel(raw_ref, gumbel_ref, out_ref, *, n_valid):
    """Global gumbel-softmax over dim 0 (tau=1, hard=False), scaled by N.

    raw/gumbel/out are one lane-dense (1, N_pad) slab in VMEM; the trailing
    (N_pad - n_valid) lanes are padding and are masked out.
    """
    logits = raw_ref[...] + gumbel_ref[...]                     # tau = 1.0
    lane = lax.broadcasted_iota(jnp.int32, logits.shape, 1)
    valid = lane < n_valid
    logits = jnp.where(valid, logits, jnp.float32(-1e30))
    m = jnp.max(logits, axis=-1, keepdims=True)
    p = jnp.where(valid, jnp.exp(logits - m), 0.0)
    denom = jnp.sum(p, axis=-1, keepdims=True)
    out_ref[...] = p * (jnp.float32(n_valid) / denom)


def init_reweight_params(key, feature_dim, hidden=_HIDDEN):
    """PyTorch nn.Linear default init U(-1/sqrt(fan_in), 1/sqrt(fan_in)),
    stored in kernel-friendly layouts:
       w1: (hidden, feature_dim)   (== PyTorch weight layout)
       b1: (hidden, 1)
       w2: (hidden, 1)             (== PyTorch Linear(128,1) weight, transposed)
       b2: (1, 1)
    """
    k1, k2, k3, k4 = jax.random.split(key, 4)
    bound1 = 1.0 / math.sqrt(feature_dim)
    bound2 = 1.0 / math.sqrt(hidden)
    w1 = jax.random.uniform(k1, (hidden, feature_dim), jnp.float32, -bound1, bound1)
    b1 = jax.random.uniform(k2, (hidden, 1), jnp.float32, -bound1, bound1)
    w2 = jax.random.uniform(k3, (hidden, 1), jnp.float32, -bound2, bound2)
    b2 = jax.random.uniform(k4, (1, 1), jnp.float32, -bound2, bound2)
    return w1, b1, w2, b2


def reweight_net(x, params, key, training=False, row_tile=1024):
    """ReweightNet.forward: x (N, D) -> weights (N,), sum(weights) == N."""
    n, d = x.shape
    w1, b1, w2, b2 = params
    hidden = w1.shape[0]

    # Row tiling: batch rows land on the 128-wide lane axis of the output, so
    # the tile must be a multiple of 128; pad N up to a whole number of tiles.
    tile = min(row_tile, _round_up(n, 128))
    n_pad = _round_up(n, tile)
    x_p = jnp.pad(x, ((0, n_pad - n), (0, 0))) if n_pad != n else x

    k_g, k_s = jax.random.split(key)
    gumbel = jax.random.gumbel(k_g, (1, n_pad), jnp.float32)
    seed = jax.random.randint(k_s, (1,), 0, jnp.iinfo(jnp.int32).max, jnp.int32)

    bytes_accessed = (x_p.size * x_p.dtype.itemsize + 4 * n_pad
                      + sum(p.size * p.dtype.itemsize for p in params))
    cost = pl.CostEstimate(flops=2 * n_pad * hidden * (d + 1),
                           transcendentals=0,
                           bytes_accessed=bytes_accessed)

    # Pass 1: row-tiled, pipelined MLP -> lane-dense raw weights (1, N_pad).
    raw = pl.pallas_call(
        functools.partial(_mlp_logits_kernel, training=training),
        out_shape=jax.ShapeDtypeStruct((1, n_pad), jnp.float32),
        grid_spec=pltpu.PrefetchScalarGridSpec(
            num_scalar_prefetch=1,                       # dropout seed (SMEM)
            grid=(n_pad // tile,),
            in_specs=[
                pl.BlockSpec((tile, d), lambda i, s: (i, 0)),     # x rows
                pl.BlockSpec((hidden, d), lambda i, s: (0, 0)),   # w1
                pl.BlockSpec((hidden, 1), lambda i, s: (0, 0)),   # b1
                pl.BlockSpec((hidden, 1), lambda i, s: (0, 0)),   # w2
                pl.BlockSpec((1, 1), lambda i, s: (0, 0)),        # b2
            ],
            out_specs=pl.BlockSpec((1, tile), lambda i, s: (0, i)),
        ),
        compiler_params=pltpu.CompilerParams(
            dimension_semantics=("parallel",)),          # megacore-shard tiles
        cost_estimate=cost,
    )(seed, x_p, w1, b1, w2, b2)

    # Pass 2: global gumbel-softmax over all N rows, scaled by N.
    weights = pl.pallas_call(
        functools.partial(_gumbel_softmax_kernel, n_valid=n),
        out_shape=jax.ShapeDtypeStruct((1, n_pad), jnp.float32),
        in_specs=[pl.BlockSpec(memory_space=pltpu.MemorySpace.VMEM)] * 2,
        out_specs=pl.BlockSpec(memory_space=pltpu.MemorySpace.VMEM),
    )(raw, gumbel)

    return weights[0, :n]


if __name__ == "__main__":
    key = jax.random.PRNGKey(0)
    k_x, k_p, k_noise = jax.random.split(key, 3)

    N, FEATURE_DIM = 8, 32
    x = jax.random.normal(k_x, (N, FEATURE_DIM), jnp.float32)
    params = init_reweight_params(k_p, FEATURE_DIM)

    weights = reweight_net(x, params, k_noise, training=False)
    weights = jax.block_until_ready(weights)

    assert weights.shape == (N,)
    assert bool(jnp.all(weights >= 0.0))
    # gumbel_softmax output sums to 1, scaled by N -> sums to N
    assert abs(float(jnp.sum(weights)) - float(N)) < 1e-3

    print("KERNEL_OK")
</pallas_src>

<mosaic_0001>
module attributes {stable_mosaic.version = 11 : i64} {
  func.func @_mlp_logits_kernel(%arg0: i32, %arg1: memref<1xi32, #tpu.memory_space<smem>>, %arg2: memref<128x32xf32, #tpu.memory_space<vmem>>, %arg3: memref<128x32xf32, #tpu.memory_space<vmem>>, %arg4: memref<128x1xf32, #tpu.memory_space<vmem>>, %arg5: memref<128x1xf32, #tpu.memory_space<vmem>>, %arg6: memref<1x1xf32, #tpu.memory_space<vmem>>, %arg7: memref<1x128xf32, #tpu.memory_space<vmem>>) attributes {dimension_semantics = [#tpu.dimension_semantics<parallel>], iteration_bounds = array<i64: 1>, scalar_prefetch = 1 : i64, scratch_operands = 0 : i64, tpu.core_type = #tpu.core_type<tc>, window_params = [{transform_indices = @transform_0, window_bounds = array<i64: 128, 32>}, {pipeline_mode = #tpu.pipeline_mode<synchronous>, transform_indices = @transform_1, window_bounds = array<i64: 128, 32>}, {pipeline_mode = #tpu.pipeline_mode<synchronous>, transform_indices = @transform_2, window_bounds = array<i64: 128, 1>}, {pipeline_mode = #tpu.pipeline_mode<synchronous>, transform_indices = @transform_3, window_bounds = array<i64: 128, 1>}, {pipeline_mode = #tpu.pipeline_mode<synchronous>, transform_indices = @transform_4, window_bounds = array<i64: 1, 1>}, {transform_indices = @transform_5, window_bounds = array<i64: 1, 128>}]} {
    %c0 = arith.constant 0 : index
    %c0_0 = arith.constant 0 : index
    %0 = vector.load %arg3[%c0, %c0_0] : memref<128x32xf32, #tpu.memory_space<vmem>>, vector<128x32xf32>
    %c0_1 = arith.constant 0 : index
    %c0_2 = arith.constant 0 : index
    %1 = vector.load %arg2[%c0_1, %c0_2] : memref<128x32xf32, #tpu.memory_space<vmem>>, vector<128x32xf32>
    %cst = arith.constant dense<0.000000e+00> : vector<128x128xf32>
    %2 = tpu.matmul %0, %1, %cst {dimension_numbers = #tpu.dot_dimension_numbers<[1], [1], [0], [0], [0, 0, 1, 0], [], []>} : vector<128x32xf32>, vector<128x32xf32>, vector<128x128xf32> -> vector<128x128xf32>
    %c0_3 = arith.constant 0 : index
    %c0_4 = arith.constant 0 : index
    %3 = vector.load %arg4[%c0_3, %c0_4] : memref<128x1xf32, #tpu.memory_space<vmem>>, vector<128x1xf32>
    %4 = vector.broadcast %3 : vector<128x1xf32> to vector<128x128xf32>
    %5 = arith.addf %2, %4 : vector<128x128xf32>
    %cst_5 = arith.constant 0.000000e+00 : f32
    %6 = vector.broadcast %cst_5 : f32 to vector<128x128xf32>
    %7 = arith.maximumf %5, %6 : vector<128x128xf32>
    %c0_6 = arith.constant 0 : index
    %c0_7 = arith.constant 0 : index
    %8 = vector.load %arg5[%c0_6, %c0_7] : memref<128x1xf32, #tpu.memory_space<vmem>>, vector<128x1xf32>
    %9 = vector.broadcast %8 : vector<128x1xf32> to vector<128x128xf32>
    %10 = arith.mulf %7, %9 : vector<128x128xf32>
    %cst_8 = arith.constant dense<0.000000e+00> : vector<128xf32>
    %11 = vector.multi_reduction <add>, %10, %cst_8 [0] : vector<128x128xf32> to vector<128xf32>
    %12 = vector.shape_cast %11 : vector<128xf32> to vector<1x128xf32>
    %c0_9 = arith.constant 0 : index
    %c0_10 = arith.constant 0 : index
    %13 = vector.load %arg6[%c0_9, %c0_10] : memref<1x1xf32, #tpu.memory_space<vmem>>, vector<1x1xf32>
    %14 = vector.broadcast %13 : vector<1x1xf32> to vector<1x128xf32>
    %15 = arith.addf %12, %14 : vector<1x128xf32>
    %c0_11 = arith.constant 0 : index
    %c0_12 = arith.constant 0 : index
    %16 = vector.load %arg7[%c0_11, %c0_12] : memref<1x128xf32, #tpu.memory_space<vmem>>, vector<1x128xf32>
    tpu.vector_store %arg7[%c0_11, %c0_12], %15 {strides = array<i32>} : memref<1x128xf32, #tpu.memory_space<vmem>>, vector<1x128xf32>,
    return
  }
  func.func @transform_0(%arg0: i32, %arg1: memref<1xi32, #tpu.memory_space<smem>>) -> (i32, i32) {
    %c0_i32 = arith.constant 0 : i32
    %c0_i32_0 = arith.constant 0 : i32
    return %arg0, %c0_i32 : i32, i32
  }
  func.func @transform_1(%arg0: i32, %arg1: memref<1xi32, #tpu.memory_space<smem>>) -> (i32, i32) {
    %c0_i32 = arith.constant 0 : i32
    %c0_i32_0 = arith.constant 0 : i32
    %c0_i32_1 = arith.constant 0 : i32
    return %c0_i32, %c0_i32_0 : i32, i32
  }
  func.func @transform_2(%arg0: i32, %arg1: memref<1xi32, #tpu.memory_space<smem>>) -> (i32, i32) {
    %c0_i32 = arith.constant 0 : i32
    %c0_i32_0 = arith.constant 0 : i32
    %c0_i32_1 = arith.constant 0 : i32
    return %c0_i32, %c0_i32_0 : i32, i32
  }
  func.func @transform_3(%arg0: i32, %arg1: memref<1xi32, #tpu.memory_space<smem>>) -> (i32, i32) {
    %c0_i32 = arith.constant 0 : i32
    %c0_i32_0 = arith.constant 0 : i32
    %c0_i32_1 = arith.constant 0 : i32
    return %c0_i32, %c0_i32_0 : i32, i32
  }
  func.func @transform_4(%arg0: i32, %arg1: memref<1xi32, #tpu.memory_space<smem>>) -> (i32, i32) {
    %c0_i32 = arith.constant 0 : i32
    %c0_i32_0 = arith.constant 0 : i32
    %c0_i32_1 = arith.constant 0 : i32
    return %c0_i32, %c0_i32_0 : i32, i32
  }
  func.func @transform_5(%arg0: i32, %arg1: memref<1xi32, #tpu.memory_space<smem>>) -> (i32, i32) {
    %c0_i32 = arith.constant 0 : i32
    %c0_i32_0 = arith.constant 0 : i32
    return %c0_i32, %arg0 : i32, i32
  }
}

</mosaic_0001>

<bundles_post_ra>
// kernel: tpu_custom_call.1
= control target key start
LH: loop header
LB: loop body
LE: loop exit
PB: predicated region body
PF: predicated region fallthrough
CT: control target
= control target key end

     0   :  { %s1112_s0 = inlined_call_operand.<no memory space> [shape: s32[1], index: 0, kind: input, shape index: {}]   ;;  %s1113_s1 = inlined_call_operand.vmem [shape: f32[128,32], index: 1, kind: input, shape index: {}]   ;;  %s1114_s2 = inlined_call_operand.vmem [shape: f32[128,32], index: 2, kind: input, shape index: {}]   ;;  %s1115_s3 = inlined_call_operand.vmem [shape: f32[128,1], index: 3, kind: input, shape index: {}]   ;;  %s1116_s4 = inlined_call_operand.vmem [shape: f32[128,1], index: 4, kind: input, shape index: {}]   ;;  %s1117_s5 = inlined_call_operand.<no memory space> [shape: f32[1,1], index: 5, kind: input, shape index: {}]   ;;  %s1118_s6 = inlined_call_operand.hbm [shape: f32[1,128], index: 6, kind: output, shape index: {}]  }
   0x1   :  { %v12_v0 = vstv %s1117_s5 }
   0x2   :  { %13 = vst [vmem:[#allocation4] sm:$0x1] %v12_v0 }
   0x3   :  { %v41_v1 = vld [vmem:[%s1113_s1] sm:$0xff]  ;;  %v42_v2 = vld [vmem:[%s1113_s1 + $0x8] sm:$0xff]  ;;  %vm153_vm0 = vcmask 261120   ;;  %v43_v3 = vld [vmem:[%s1113_s1 + $0x10] sm:$0xff]  ;;  %v782_v7 = vmov 0  }
   0x4   :  { %v690_v4 = vpack.c.bf16 %v42_v2, %v41_v1  ;;  %vm833_vm1 = vmpackc.low %vm153_vm0, %vm153_vm0  ;;  %v44_v6 = vld [vmem:[%s1113_s1 + $0x18] sm:$0xff]  ;;  %756 = vset.pattern.permute.xlu0 %v782_v7  ;;  %757 = vset.pattern.permute.xlu1 %v782_v7  ;;  %v45_v9 = vld [vmem:[%s1113_s1 + $0x20] sm:$0xff] }
   0x5   :  { %v696_v8 = vpack.c.bf16 %v44_v6, %v43_v3  ;;  %v57_v10 = vld [vmem:[%s1115_s3] sm:$0xff]  ;;  %v46_v11 = vld [vmem:[%s1113_s1 + $0x28] sm:$0xff]  ;;  %v59_v12 = vld [vmem:[%s1115_s3 + $0x10] sm:$0xff] }
   0x6   :  { %692 = vmatprep.subr.msk.bf16.mxu0 %vm833_vm1, %v690_v4  ;;  %738 = vmatprep.subr.msk.bf16.mxu1 %vm833_vm1, %v690_v4  ;;  %v25_v13 = vld [vmem:[%s1114_s2] sm:$0xff]  ;;  %v58_v14 = vld [vmem:[%s1115_s3 + $0x8] sm:$0xff]  ;;  %v60_v16 = vld [vmem:[%s1115_s3 + $0x18] sm:$0xff]  ;;  %v702_v17 = vpack.c.bf16 %v46_v11, %v45_v9 }
   0x7   :  { %695 = vmatpush3.bf16.xpose.msk.msra.mxu0 %vm833_vm1, %v690_v4  ;;  %746 = vmatpush3.bf16.xpose.msk.msra.mxu1 %vm833_vm1, %v690_v4  ;;  %v33_v15 = vld [vmem:[%s1114_s2 + $0x40] sm:$0xff]  ;;  %v47_v20 = vld [vmem:[%s1113_s1 + $0x30] sm:$0xff]  ;;  %v48_v21 = vld [vmem:[%s1113_s1 + $0x38] sm:$0xff] }
   0x8   :  { %698 = vmatprep.subr.msk.bf16.mxu0 %vm833_vm1, %v696_v8  ;;  %739 = vmatprep.subr.msk.bf16.mxu1 %vm833_vm1, %v696_v8  ;;  %v61_v18 = vld [vmem:[%s1115_s3 + $0x20] sm:$0xff]  ;;  %v412_v22 = vld [vmem:[%s1116_s4 + $0x8] sm:$0xff]  ;;  %v413_v23 = vld [vmem:[%s1116_s4 + $0x10] sm:$0xff]  ;;  %v708_v24 = vpack.c.bf16 %v48_v21, %v47_v20 }
   0x9   :  { %75 = vperm.xlu0 %756, %v57_v10   ;;  %85 = vperm.xlu1 %757, %v59_v12   ;;  %v411_v19 = vld [vmem:[%s1116_s4] sm:$0xff]  ;;  %v62_v25 = vld [vmem:[%s1115_s3 + $0x28] sm:$0xff]  ;;  %v414_v26 = vld [vmem:[%s1116_s4 + $0x18] sm:$0xff] }
   0xa   :  { %666 = vmatprep.mubr.msk.f32.mxu0 %vm153_vm0, %v25_v13  ;;  %678 = vmatprep.mubr.msk.f32.mxu1 %vm153_vm0, %v33_v15  ;;  %v49_v27 = vld [vmem:[%s1113_s1 + $0x40] sm:$0xff]  ;;  %v50_v28 = vld [vmem:[%s1113_s1 + $0x48] sm:$0xff] }
   0xd   :  { %80 = vperm.xlu0 %756, %v58_v14   ;;  %90 = vperm.xlu1 %757, %v60_v16  }
   0xf   :  { %701 = vmatpush3.bf16.xpose.msk.msra.mxu0 %vm833_vm1, %v696_v8  ;;  %747 = vmatpush3.bf16.xpose.msk.msra.mxu1 %vm833_vm1, %v696_v8 }
  0x10   :  { %704 = vmatprep.subr.msk.bf16.mxu0 %vm833_vm1, %v702_v17  ;;  %740 = vmatprep.subr.msk.bf16.mxu1 %vm833_vm1, %v702_v17 }
  0x11   :  { %95 = vperm.xlu0 %756, %v61_v18   ;;  %429 = vperm.xlu1 %757, %v411_v19  }
  0x15   :  { %434 = vperm.xlu0 %756, %v412_v22   ;;  %439 = vperm.xlu1 %757, %v413_v23  }
  0x17   :  { %707 = vmatpush3.bf16.xpose.msk.msra.mxu0 %vm833_vm1, %v702_v17  ;;  %748 = vmatpush3.bf16.xpose.msk.msra.mxu1 %vm833_vm1, %v702_v17 }
  0x18   :  { %710 = vmatprep.subr.msk.bf16.mxu0 %vm833_vm1, %v708_v24  ;;  %741 = vmatprep.subr.msk.bf16.mxu1 %vm833_vm1, %v708_v24 }
  0x19   :  { %100 = vperm.xlu0 %756, %v62_v25  }
  0x1a   :  { %14 = vsyncpa [#allocation6], 0  ;;  %v63_v29 = vld [vmem:[%s1115_s3 + $0x30] sm:$0xff]  ;;  %444 = vperm.xlu1 %757, %v414_v26   ;;  %v415_v30 = vld [vmem:[%s1116_s4 + $0x20] sm:$0xff]  ;;  %v714_v31 = vpack.c.bf16 %v50_v28, %v49_v27 }
  0x1b   :  { %v64_v32 = vld [vmem:[%s1115_s3 + $0x38] sm:$0xff]  ;;  %v416_v33 = vld [vmem:[%s1116_s4 + $0x28] sm:$0xff]  ;;  %v51_v34 = vld [vmem:[%s1113_s1 + $0x50] sm:$0xff] }
  0x1c   :  { %v52_v35 = vld [vmem:[%s1113_s1 + $0x58] sm:$0xff]  ;;  %v65_v36 = vld [vmem:[%s1115_s3 + $0x40] sm:$0xff]  ;;  %v417_v37 = vld [vmem:[%s1116_s4 + $0x30] sm:$0xff] }
  0x1d   :  { %105 = vperm.xlu0 %756, %v63_v29   ;;  %v720_v38 = vpack.c.bf16 %v52_v35, %v51_v34  ;;  %v66_v39 = vld [vmem:[%s1115_s3 + $0x48] sm:$0xff]  ;;  %v418_v40 = vld [vmem:[%s1116_s4 + $0x38] sm:$0xff]  ;;  %v53_v41 = vld [vmem:[%s1113_s1 + $0x60] sm:$0xff] }
  0x1e   :  { %449 = vperm.xlu1 %757, %v415_v30   ;;  %v54_v42 = vld [vmem:[%s1113_s1 + $0x68] sm:$0xff]  ;;  %v67_v43 = vld [vmem:[%s1115_s3 + $0x50] sm:$0xff]  ;;  %v419_v44 = vld [vmem:[%s1116_s4 + $0x40] sm:$0xff] }
  0x1f   :  { %713 = vmatpush3.bf16.xpose.msk.msra.mxu0 %vm833_vm1, %v708_v24  ;;  %749 = vmatpush3.bf16.xpose.msk.msra.mxu1 %vm833_vm1, %v708_v24  ;;  %v726_v45 = vpack.c.bf16 %v54_v42, %v53_v41  ;;  %v68_v46 = vld [vmem:[%s1115_s3 + $0x58] sm:$0xff]  ;;  %v420_v47 = vld [vmem:[%s1116_s4 + $0x48] sm:$0xff]  ;;  %v55_v48 = vld [vmem:[%s1113_s1 + $0x70] sm:$0xff] }
  0x20   :  { %716 = vmatprep.subr.msk.bf16.mxu0 %vm833_vm1, %v714_v31  ;;  %742 = vmatprep.subr.msk.bf16.mxu1 %vm833_vm1, %v714_v31  ;;  %v56_v49 = vld [vmem:[%s1113_s1 + $0x78] sm:$0xff]  ;;  %v69_v50 = vld [vmem:[%s1115_s3 + $0x60] sm:$0xff]  ;;  %v421_v51 = vld [vmem:[%s1116_s4 + $0x50] sm:$0xff] }
  0x21   :  { %110 = vperm.xlu0 %756, %v64_v32   ;;  %v732_v52 = vpack.c.bf16 %v56_v49, %v55_v48  ;;  %v70_v53 = vld [vmem:[%s1115_s3 + $0x68] sm:$0xff]  ;;  %v422_v54 = vld [vmem:[%s1116_s4 + $0x58] sm:$0xff]  ;;  %v71_v55 = vld [vmem:[%s1115_s3 + $0x70] sm:$0xff] }
  0x22   :  { %454 = vperm.xlu1 %757, %v416_v33   ;;  %v423_v56 = vld [vmem:[%s1116_s4 + $0x60] sm:$0xff]  ;;  %v72_v57 = vld [vmem:[%s1115_s3 + $0x78] sm:$0xff]  ;;  %v424_v58 = vld [vmem:[%s1116_s4 + $0x68] sm:$0xff] }
  0x23   :  { %v425_v59 = vld [vmem:[%s1116_s4 + $0x70] sm:$0xff]  ;;  %v26_v60 = vld [vmem:[%s1114_s2 + $0x8] sm:$0xff]  ;;  %v426_v0 = vld [vmem:[%s1116_s4 + $0x78] sm:$0xff] }
  0x24   :  { %v34_v61 = vld [vmem:[%s1114_s2 + $0x48] sm:$0xff]  ;;  %v27_v62 = vld [vmem:[%s1114_s2 + $0x10] sm:$0xff]  ;;  %v544_v1 = vld [vmem:[#allocation4] sm:$0x1] }
  0x25   :  { %115 = vperm.xlu0 %756, %v65_v36   ;;  %v35_v63 = vld [vmem:[%s1114_s2 + $0x50] sm:$0xff]  ;;  %v28_v2 = vld [vmem:[%s1114_s2 + $0x18] sm:$0xff]  ;;  %v29_v4 = vld [vmem:[%s1114_s2 + $0x20] sm:$0xff] }
  0x26   :  { %459 = vperm.xlu1 %757, %v417_v37   ;;  %v36_v3 = vld [vmem:[%s1114_s2 + $0x58] sm:$0xff]  ;;  %v37_v5 = vld [vmem:[%s1114_s2 + $0x60] sm:$0xff]  ;;  %v30_v6 = vld [vmem:[%s1114_s2 + $0x28] sm:$0xff] }
  0x27   :  { %719 = vmatpush3.bf16.xpose.msk.msra.mxu0 %vm833_vm1, %v714_v31  ;;  %750 = vmatpush3.bf16.xpose.msk.msra.mxu1 %vm833_vm1, %v714_v31  ;;  %v38_v7 = vld [vmem:[%s1114_s2 + $0x68] sm:$0xff]  ;;  %v31_v8 = vld [vmem:[%s1114_s2 + $0x30] sm:$0xff]  ;;  %v32_v10 = vld [vmem:[%s1114_s2 + $0x38] sm:$0xff] }
  0x28   :  { %722 = vmatprep.subr.msk.bf16.mxu0 %vm833_vm1, %v720_v38  ;;  %743 = vmatprep.subr.msk.bf16.mxu1 %vm833_vm1, %v720_v38  ;;  %v39_v9 = vld [vmem:[%s1114_s2 + $0x70] sm:$0xff]  ;;  %v40_v11 = vld [vmem:[%s1114_s2 + $0x78] sm:$0xff]  ;;  %s783_s2 = smov [#allocation5]  }
  0x29   :  { %120 = vperm.xlu0 %756, %v66_v39   ;;  %s562_s17 = sshll.u32 %s783_s2, 4  ;;  %s563_s17 = int_to_ptr.vmem [resolvable:$true] %s562_s17 }
  0x2a   :  { %464 = vperm.xlu1 %757, %v418_v40   ;;  %s758_s3 = scalar_lea.vmem %s563_s17, 16  ;;  %s762_s18 = scalar_lea.vmem %s563_s17, 32 }
  0x2b   :  { %p759_p0 = scmp.ne.s32.totalorder %s563_s17, %s758_s3  ;;  %p763_p1 = scmp.lt.s32.totalorder %s563_s17, %s563_s17 }
  0x2c   :  { %p764_p2 = scmp.lt.s32.totalorder %s762_s18, %s758_s3 }
  0x2d   :  { %125 = vperm.xlu0 %756, %v67_v43  }
  0x2e   :  { %469 = vperm.xlu1 %757, %v419_v44   ;;  %p765_p3 = por %p764_p2, %p763_p1 }
  0x2f   :  { %725 = vmatpush3.bf16.xpose.msk.msra.mxu0 %vm833_vm1, %v720_v38  ;;  %751 = vmatpush3.bf16.xpose.msk.msra.mxu1 %vm833_vm1, %v720_v38 }
  0x30   :  { %728 = vmatprep.subr.msk.bf16.mxu0 %vm833_vm1, %v726_v45  ;;  %744 = vmatprep.subr.msk.bf16.mxu1 %vm833_vm1, %v726_v45  ;;  %p766_p4 = pnand %p765_p3, %p759_p0 }
  0x31   :  { %130 = vperm.xlu0 %756, %v68_v46  }
  0x32   :  { %474 = vperm.xlu1 %757, %v420_v47  }
  0x35   :  { %135 = vperm.xlu0 %756, %v69_v50  }
  0x36   :  { %479 = vperm.xlu1 %757, %v421_v51  }
  0x37   :  { %731 = vmatpush3.bf16.xpose.msk.msra.mxu0 %vm833_vm1, %v726_v45  ;;  %752 = vmatpush3.bf16.xpose.msk.msra.mxu1 %vm833_vm1, %v726_v45 }
  0x38   :  { %734 = vmatprep.subr.msk.bf16.mxu0 %vm833_vm1, %v732_v52  ;;  %745 = vmatprep.subr.msk.bf16.mxu1 %vm833_vm1, %v732_v52 }
  0x39   :  { %140 = vperm.xlu0 %756, %v70_v53  }
  0x3a   :  { %484 = vperm.xlu1 %757, %v422_v54  }
  0x3d   :  { %145 = vperm.xlu0 %756, %v71_v55  }
  0x3e   :  { %489 = vperm.xlu1 %757, %v423_v56  }
  0x3f   :  { %737 = vmatpush3.bf16.xpose.msk.msra.mxu0 %vm833_vm1, %v732_v52  ;;  %753 = vmatpush3.bf16.xpose.msk.msra.mxu1 %vm833_vm1, %v732_v52 }
  0x41   :  { %150 = vperm.xlu0 %756, %v72_v57  }
  0x42   :  { %494 = vperm.xlu1 %757, %v424_v58  }
  0x45   :  { %499 = vperm.xlu0 %756, %v425_v59  }
  0x46   :  { %667 = vmatmul.mubr.msk.f32.vlgmr.msra.gmra.mrb[0].mxu0 %vm153_vm0, %v26_v60  ;;  %679 = vmatmul.mubr.msk.f32.vlgmr.msra.gmra.mrb[0].mxu1 %vm153_vm0, %v34_v61 }
  0x47   :  { %669 = vmatprep.mubr.msk.f32.mxu0 %vm153_vm0, %v27_v62  ;;  %681 = vmatprep.mubr.msk.f32.mxu1 %vm153_vm0, %v35_v63 }
  0x48   :  { %504 = vperm.xlu1 %757, %v426_v0  }
  0x49   :  { %547 = vperm.xlu0 %756, %v544_v1  }
  0x4a   :  { %670 = vmatmul.mubr.msk.f32.gmra.mrb[2].mxu0 %vm153_vm0, %v28_v2  ;;  %682 = vmatmul.mubr.msk.f32.gmra.mrb[2].mxu1 %vm153_vm0, %v36_v3 }
  0x4b   :  { %672 = vmatprep.mubr.msk.f32.mxu0 %vm153_vm0, %v29_v4  ;;  %684 = vmatprep.mubr.msk.f32.mxu1 %vm153_vm0, %v37_v5 }
  0x4e   :  { %673 = vmatmul.mubr.msk.f32.gmra.mrb[4].mxu0 %vm153_vm0, %v30_v6  ;;  %685 = vmatmul.mubr.msk.f32.gmra.mrb[4].mxu1 %vm153_vm0, %v38_v7 }
  0x4f   :  { %675 = vmatprep.mubr.msk.f32.mxu0 %vm153_vm0, %v31_v8  ;;  %687 = vmatprep.mubr.msk.f32.mxu1 %vm153_vm0, %v39_v9 }
  0x52   :  { %676 = vmatmul.mubr.msk.f32.gmra.mrb[6].mxu0 %vm153_vm0, %v32_v10  ;;  %688 = vmatmul.mubr.msk.f32.gmra.mrb[6].mxu1 %vm153_vm0, %v40_v11 }
  0x88   :  { %v76_v12 = vpop.permute.xlu0 %75  ;;  %v86_v13 = vpop.permute.xlu1 %85 }
  0x8c   :  { %v81_v14 = vpop.permute.xlu0 %80  ;;  %v91_v15 = vpop.permute.xlu1 %90 }
  0x90   :  { %v96_v16 = vpop.permute.xlu0 %95  ;;  %v430_v17 = vpop.permute.xlu1 %429 }
  0x94   :  { %v435_v18 = vpop.permute.xlu0 %434  ;;  %v440_v19 = vpop.permute.xlu1 %439 }
  0x98   :  { %v101_v20 = vpop.permute.xlu0 %100 }
  0x99   :  { %v445_v21 = vpop.permute.xlu1 %444 }
  0x9c   :  { %v106_v22 = vpop.permute.xlu0 %105 }
  0x9d   :  { %v450_v23 = vpop.permute.xlu1 %449 }
  0xa0   :  { %v111_v24 = vpop.permute.xlu0 %110 }
  0xa1   :  { %v455_v25 = vpop.permute.xlu1 %454 }
  0xa4   :  { %v116_v26 = vpop.permute.xlu0 %115 }
  0xa5   :  { %v460_v27 = vpop.permute.xlu1 %459 }
  0xa8   :  { %v121_v28 = vpop.permute.xlu0 %120 }
  0xa9   :  { %v465_v29 = vpop.permute.xlu1 %464 }
  0xac   :  { %v126_v30 = vpop.permute.xlu0 %125 }
  0xad   :  { %v470_v31 = vpop.permute.xlu1 %469 }
  0xb0   :  { %v131_v32 = vpop.permute.xlu0 %130 }
  0xb1   :  { %v475_v39 = vpop.permute.xlu1 %474 }
  0xb4   :  { %v136_v50 = vpop.permute.xlu0 %135 }
  0xb5   :  { %v480_v61 = vpop.permute.xlu1 %479 }
  0xb8   :  { %v141_v11 = vpop.permute.xlu0 %140 }
 0x119   :  { %v668_v33 = vpop.f32.mrb[0].mxu0  ;;  %v680_v34 = vpop.f32.mrb[0].mxu1 }
 0x11a   :  { %v322_v35 = vadd.f32 %v668_v33, %v81_v14  ;;  %v316_v36 = vpop.f32.mrb[1].mxu0  ;;  %v356_v37 = vpop.f32.mrb[1].mxu1 }
 0x11b   :  { %v317_v38 = vadd.f32 %v316_v36, %v76_v12  ;;  %v357_v7 = vadd.f32 %v356_v37, %v116_v26  ;;  %v362_v12 = vadd.f32 %v680_v34, %v121_v28 }
 0x11c   :  { %v396_v40 = vmax.f32 %v322_v35, 0.0 }
 0x11d   :  { %v395_v41 = vmax.f32 %v317_v38, 0.0  ;;  %v671_v42 = vpop.f32.mrb[2].mxu0  ;;  %v683_v43 = vpop.f32.mrb[2].mxu1  ;;  %v404_v33 = vmax.f32 %v362_v12, 0.0 }
 0x11e   :  { %v508_v44 = vmul.f32 %v435_v18, %v396_v40  ;;  %v332_v45 = vadd.f32 %v671_v42, %v91_v15  ;;  %v326_v46 = vpop.f32.mrb[3].mxu0  ;;  %v366_v47 = vpop.f32.mrb[3].mxu1  ;;  %v403_v18 = vmax.f32 %v357_v7, 0.0  ;;  %v372_v35 = vadd.f32 %v683_v43, %v131_v32 }
 0x11f   :  { %v507_v48 = vmul.f32 %v430_v17, %v395_v41  ;;  %v327_v49 = vadd.f32 %v326_v46, %v86_v13  ;;  %v485_v17 = vpop.permute.xlu1 %484  ;;  %v146_v38 = vpop.permute.xlu0 %145  ;;  %v516_v28 = vmul.f32 %v475_v39, %v404_v33 }
 0x120   :  { %v398_v52 = vmax.f32 %v332_v45, 0.0  ;;  %v515_v26 = vmul.f32 %v470_v31, %v403_v18 }
 0x121   :  { %v523_v51 = vadd.f32 %v508_v44, %v507_v48  ;;  %v397_v53 = vmax.f32 %v327_v49, 0.0  ;;  %v674_v54 = vpop.f32.mrb[4].mxu0  ;;  %v686_v55 = vpop.f32.mrb[4].mxu1 }
 0x122   :  { %v342_v56 = vadd.f32 %v674_v54, %v101_v20  ;;  %v336_v57 = vpop.f32.mrb[5].mxu0  ;;  %v376_v58 = vpop.f32.mrb[5].mxu1  ;;  %v510_v62 = vmul.f32 %v445_v21, %v398_v52  ;;  %v382_v34 = vadd.f32 %v686_v55, %v141_v11 }
 0x123   :  { %v509_v59 = vmul.f32 %v440_v19, %v397_v53  ;;  %v337_v60 = vadd.f32 %v336_v57, %v96_v16  ;;  %v367_v19 = vadd.f32 %v366_v47, %v126_v30  ;;  %v377_v37 = vadd.f32 %v376_v58, %v136_v50  ;;  %v490_v40 = vpop.permute.xlu1 %489 }
 0x124   :  { %v400_v0 = vmax.f32 %v342_v56, 0.0  ;;  %v408_v47 = vmax.f32 %v382_v34, 0.0  ;;  %v550_v58 = vlaneseq }
 0x125   :  { %v524_v63 = vadd.f32 %v523_v51, %v509_v59  ;;  %v399_v1 = vmax.f32 %v337_v60, 0.0  ;;  %v677_v2 = vpop.f32.mrb[6].mxu0  ;;  %v689_v3 = vpop.f32.mrb[6].mxu1  ;;  %v407_v44 = vmax.f32 %v377_v37, 0.0 }
 0x126   :  { %v352_v4 = vadd.f32 %v677_v2, %v111_v24  ;;  %v346_v5 = vpop.f32.mrb[7].mxu0  ;;  %v386_v6 = vpop.f32.mrb[7].mxu1  ;;  %v512_v13 = vmul.f32 %v455_v25, %v400_v0  ;;  %v406_v25 = vmax.f32 %v372_v35, 0.0 }
 0x127   :  { %v511_v8 = vmul.f32 %v450_v23, %v399_v1  ;;  %v525_v9 = vadd.f32 %v524_v63, %v510_v62  ;;  %v347_v10 = vadd.f32 %v346_v5, %v106_v22  ;;  %v405_v23 = vmax.f32 %v367_v19, 0.0  ;;  %v495_v43 = vpop.permute.xlu1 %494 }
 0x128   :  { %v402_v15 = vmax.f32 %v352_v4, 0.0  ;;  %v387_v30 = vadd.f32 %v386_v6, %v146_v38  ;;  %v518_v46 = vmul.f32 %v485_v17, %v406_v25  ;;  %v519_v48 = vmul.f32 %v490_v40, %v407_v44 }
 0x129   :  { %v526_v14 = vadd.f32 %v525_v9, %v511_v8  ;;  %v401_v16 = vmax.f32 %v347_v10, 0.0  ;;  %v517_v42 = vmul.f32 %v480_v61, %v405_v23  ;;  %v520_v50 = vmul.f32 %v495_v43, %v408_v47 }
 0x12a   :  { %v514_v24 = vmul.f32 %v465_v29, %v402_v15  ;;  %v409_v31 = vmax.f32 %v387_v30, 0.0  ;;  %v551_v61 = vshrl.u32 %v550_v58, 7 }
 0x12b   :  { %v513_v20 = vmul.f32 %v460_v27, %v401_v16  ;;  %v527_v21 = vadd.f32 %v526_v14, %v512_v13  ;;  %v151_v27 = vpop.permute.xlu0 %150  ;;  %v505_v55 = vpop.permute.xlu1 %504 }
 0x12c   :  { %v392_v32 = vadd.f32 %v689_v3, %v151_v27  ;;  %v552_v0 = vsub.s32 0, %v551_v61 }
 0x12d   :  { %v528_v36 = vadd.f32 %v527_v21, %v513_v20 }
 0x12e   :  { %v410_v51 = vmax.f32 %v392_v32, 0.0 }
 0x12f   :  { %v529_v22 = vadd.f32 %v528_v36, %v514_v24  ;;  %v500_v39 = vpop.permute.xlu0 %499 }
 0x130   :  { %v521_v53 = vmul.f32 %v500_v39, %v409_v31  ;;  %v522_v56 = vmul.f32 %v505_v55, %v410_v51 }
 0x131   :  { %v530_v41 = vadd.f32 %v529_v22, %v515_v26 }
 0x133   :  { %v531_v45 = vadd.f32 %v530_v41, %v516_v28  ;;  %v548_v2 = vpop.permute.xlu0 %547 }
 0x134   :  { %v553_v4 = vrot.slane %v548_v2, %v552_v0 }
 0x135   :  { %v532_v29 = vadd.f32 %v531_v45, %v517_v42 }
 0x137   :  { %v533_v49 = vadd.f32 %v532_v29, %v518_v46 }
 0x139   :  { %v534_v52 = vadd.f32 %v533_v49, %v519_v48 }
 0x13b   :  { %v535_v54 = vadd.f32 %v534_v52, %v520_v50 }
 0x13d   :  { %v536_v57 = vadd.f32 %v535_v54, %v521_v53 }
 0x13f   :  { %v537_v59 = vadd.f32 %v536_v57, %v522_v56 }
 0x141   :  { %v538_v60 = vrot.slane %v537_v59, 4 }
 0x143   :  { %v539_v62 = vadd.f32 %v538_v60, %v537_v59 }
 0x145   :  { %v540_v63 = vrot.slane %v539_v62, 2 }
 0x147   :  { %v541_v1 = vadd.f32 %v540_v63, %v539_v62 }
 0x149   :  { %v542_v3 = vrot.slane %v541_v1, 1 }
 0x14b   :  { %v543_v5 = vadd.f32 %v542_v3, %v541_v1 }
 0x14d   :  { %v554_v6 = vadd.f32 %v553_v4, %v543_v5 }
 0x14f   :  { %555 = vst [vmem:[#allocation5] sm:$0x1] %v554_v6 }
 0x150   :  { %769 = shalt.err (!%p766_p4)
}
 0x151   :  { %s770_s21 = scalar_lea.hbm %s1118_s6, 16 }
 0x152   :  { %p771_p5 = scmp.ne.s32.totalorder %s1118_s6, %s770_s21  ;;  %p774_p6 = scmp.lt.u32.totalorder %s770_s21, %s1118_s6 }
 0x154   :  { %p776_p7 = pnand %p774_p6, %p771_p5 }
 0x156   :  { %779 = shalt.err (!%p776_p7)
}
 0x157   :  { %565 = dma.vmem_to_hbm [thread:$0]  %s563_s17, 16, %s1118_s6, [#allocation6]  }
 0x158   :  { %780 = dma.done.wait [#allocation6], 16  }
 0x159   :  { %781 = vsyncadd [#allocation6], 4294967280 }
 0x15a   :  { %569 = vsyncpa [#allocation6], 1 }

</bundles_post_ra>
